<compile_context>
chip_gen: v7x
topology: tpu7x:2x2x1
jax: 0.10.0
libtpu: 0.0.40
codegen_flags: <defaults>
</compile_context>

<pallas_src>
import functools
import itertools

import jax
import jax.numpy as jnp
import numpy as np
from jax.experimental import pallas as pl
from jax.experimental.pallas import tpu as pltpu

MP = 128  # targets padded to one full lane width (lane-dense output)


# ----------------------------------------------------------------------------
# host-side helpers copied from the reference semantics
# ----------------------------------------------------------------------------
def search_query_pos(lst, query):
    start = -1
    end = -1
    for i in range(len(lst)):
        if lst[i:i + len(query)] == query and lst[i - 1] in [101, 1012, 0]:
            start = i
            end = i + len(query) - 1
            break
    return (start, end)


class ToyTokenizer:
    """Deterministic stand-in for the HF tokenizer (synthetic vocab)."""
    _vocab = {"cat": [2001], "dog": [2002], "bird": [2003, 2004]}

    class _Out:
        def __init__(self, ids):
            self.input_ids = ids

    def __call__(self, text):
        name = text.replace(". ", "").strip()
        return ToyTokenizer._Out([101] + self._vocab[name] + [1012] + [102])

    def decode(self, ids):
        return " ".join(str(int(i)) for i in ids)


def _round_up(x, m):
    return (x + m - 1) // m * m


def box_features_cxcywh(boxes):
    """[K, 4] cxcywh -> [K, 9] = (cx, cy, w, h, x0, y0, x1, y1, area)."""
    boxes = boxes.astype(jnp.float32)
    cx, cy, w, h = boxes[:, 0], boxes[:, 1], boxes[:, 2], boxes[:, 3]
    x0 = cx - 0.5 * w
    y0 = cy - 0.5 * h
    x1 = cx + 0.5 * w
    y1 = cy + 0.5 * h
    area = (x1 - x0) * (y1 - y0)
    return jnp.stack([cx, cy, w, h, x0, y0, x1, y1, area], axis=-1)


# ----------------------------------------------------------------------------
# Pallas kernel: fused cost matrix (one TILE_N x Mp tile per grid step)
# ----------------------------------------------------------------------------
def _matcher_cost_kernel(logits_ref, segw_ref, obox_ref, tbox_ref, out_ref,
                         *, w_class, w_bbox, w_giou, focal_alpha, eps):
    alpha = focal_alpha
    tile_n, mp = out_ref.shape

    # ---- focal classification cost (gamma == 2 -> explicit squares, VPU) -----
    p = jax.nn.sigmoid(logits_ref[...].astype(jnp.float32))            # [tn, T]
    q = 1.0 - p
    neg_cost = (1.0 - alpha) * (p * p) * (-jnp.log(q + eps))
    pos_cost = alpha * (q * q) * (-jnp.log(p + eps))
    cca = pos_cost - neg_cost                                          # [tn, T]
    # per-target segment mean == matmul with normalized membership matrix (MXU)
    cost_class = jnp.dot(cca, segw_ref[...],
                         preferred_element_type=jnp.float32)           # [tn, Mp]

    # ---- box features ---------------------------------------------------------
    ob = obox_ref[...].astype(jnp.float32)   # [tn, 9] : cx cy w h x0 y0 x1 y1 area
    tb = tbox_ref[...].astype(jnp.float32)   # [9, Mp] : cx cy w h x0 y0 x1 y1 area

    shape = (tile_n, mp)
    # hoist the reused query-side columns to full tiles ONCE (no broadcast CSE in JAX)
    o_cx = jnp.broadcast_to(ob[:, 0:1], shape)
    o_cy = jnp.broadcast_to(ob[:, 1:2], shape)
    o_w = jnp.broadcast_to(ob[:, 2:3], shape)
    o_h = jnp.broadcast_to(ob[:, 3:4], shape)
    ox0 = jnp.broadcast_to(ob[:, 4:5], shape)
    oy0 = jnp.broadcast_to(ob[:, 5:6], shape)
    ox1 = jnp.broadcast_to(ob[:, 6:7], shape)
    oy1 = jnp.broadcast_to(ob[:, 7:8], shape)
    area_o = jnp.broadcast_to(ob[:, 8:9], shape)

    t_cx = tb[0:1, :]
    t_cy = tb[1:2, :]
    t_w = tb[2:3, :]
    t_h = tb[3:4, :]
    tx0 = tb[4:5, :]
    ty0 = tb[5:6, :]
    tx1 = tb[6:7, :]
    ty1 = tb[7:8, :]
    area_t = tb[8:9, :]

    # ---- pairwise L1 (cdist, p=1) on cxcywh -----------------------------------
    cost_bbox = (jnp.abs(o_cx - t_cx) + jnp.abs(o_cy - t_cy) +
                 jnp.abs(o_w - t_w) + jnp.abs(o_h - t_h))              # [tn, Mp]

    # ---- pairwise generalized IoU ---------------------------------------------
    lt_x = jnp.maximum(ox0, tx0)
    lt_y = jnp.maximum(oy0, ty0)
    rb_x = jnp.minimum(ox1, tx1)
    rb_y = jnp.minimum(oy1, ty1)
    iw = jnp.maximum(rb_x - lt_x, 0.0)
    ih = jnp.maximum(rb_y - lt_y, 0.0)
    inter = iw * ih                                                    # [tn, Mp]
    union = area_o + area_t - inter
    # clamp denominators: exact no-op for valid boxes, avoids NaN for degenerate ones
    iou = inter / jnp.maximum(union, 1e-12)

    ex0 = jnp.minimum(ox0, tx0)
    ey0 = jnp.minimum(oy0, ty0)
    ex1 = jnp.maximum(ox1, tx1)
    ey1 = jnp.maximum(oy1, ty1)
    ew = jnp.maximum(ex1 - ex0, 0.0)
    eh = jnp.maximum(ey1 - ey0, 0.0)
    earea = ew * eh
    giou = iou - (earea - union) / jnp.maximum(earea, 1e-12)
    cost_giou = -giou                                                  # [tn, Mp]

    out_ref[...] = (w_bbox * cost_bbox + w_class * cost_class +
                    w_giou * cost_giou).astype(out_ref.dtype)


def matcher_cost_matrix(logits_flat, seg_w, obox_feat, tbox_feat,
                        *, cost_class, cost_bbox, cost_giou, focal_alpha,
                        eps=1e-5, tile_n=256):
    """Returns the [N, Mp] cost matrix (rows = queries, cols = padded targets)."""
    N, T = logits_flat.shape
    Mp = seg_w.shape[1]

    tile_n = min(int(tile_n), _round_up(N, 8))
    Np = _round_up(N, tile_n)
    if Np != N:
        pad = Np - N
        # zero padding rows are safe: sigmoid(0)=0.5, area=0, clamped denominators
        logits_flat = jnp.pad(logits_flat, ((0, pad), (0, 0)))
        obox_feat = jnp.pad(obox_feat, ((0, pad), (0, 0)))

    kernel = functools.partial(
        _matcher_cost_kernel,
        w_class=float(cost_class), w_bbox=float(cost_bbox),
        w_giou=float(cost_giou), focal_alpha=float(focal_alpha), eps=float(eps))

    cost_est = pl.CostEstimate(
        flops=int(2 * Np * T * Mp + 60 * Np * Mp + 10 * Np * T),
        transcendentals=int(3 * Np * T),
        bytes_accessed=int(4 * (Np * T + Np * Mp + T * Mp + Np * 9 + 9 * Mp)),
    )

    out = pl.pallas_call(
        kernel,
        out_shape=jax.ShapeDtypeStruct((Np, Mp), jnp.float32),
        grid=(Np // tile_n,),
        in_specs=[
            pl.BlockSpec((tile_n, T), lambda i: (i, 0)),    # logits tile
            pl.BlockSpec((T, Mp), lambda i: (0, 0)),        # seg_w (resident)
            pl.BlockSpec((tile_n, 9), lambda i: (i, 0)),    # query box features tile
            pl.BlockSpec((9, Mp), lambda i: (0, 0)),        # target box features (resident)
        ],
        out_specs=pl.BlockSpec((tile_n, Mp), lambda i: (i, 0)),
        compiler_params=pltpu.CompilerParams(
            dimension_semantics=("parallel",)),              # megacore sharding on v7x
        cost_estimate=cost_est,
    )(logits_flat, seg_w, obox_feat, tbox_feat)
    return out[:N]


# ----------------------------------------------------------------------------
# HungarianMatcher (JAX / Pallas)
# ----------------------------------------------------------------------------
class HungarianMatcher:
    def __init__(self, cost_class=1.0, cost_bbox=1.0, cost_giou=1.0,
                 focal_alpha=0.25, **kwargs):
        assert cost_class != 0 or cost_bbox != 0 or cost_giou != 0
        self.cost_class = cost_class
        self.cost_bbox = cost_bbox
        self.cost_giou = cost_giou
        self.focal_alpha = focal_alpha
        self.tokenizer = kwargs.get("tokenizer", None)
        self.has_bbox_supervision = kwargs.get("has_bbox_supervision", True)

    @staticmethod
    def _linear_sum_assignment(cost):
        # TODO(synk): Hungarian assignment (scipy.optimize.linear_sum_assignment) has no
        # clean Pallas equivalent; brute-force over permutations for the tiny M here.
        nq, nt = cost.shape
        assert nt <= nq
        best_perm, best_cost = None, np.inf
        for perm in itertools.permutations(range(nq), nt):
            c = cost[list(perm), range(nt)].sum()
            if c < best_cost:
                best_cost, best_perm = c, perm
        rows = np.array(best_perm, dtype=np.int64)
        cols = np.arange(nt, dtype=np.int64)
        order = np.argsort(rows)
        return rows[order], cols[order]

    def forward(self, outputs, targets, eps=1e-5):
        bs, num_queries = outputs["pred_logits"].shape[:2]
        T = outputs["pred_logits"].shape[2]

        # ---- host-side text-span extraction (glue, exactly as in PyTorch) ----
        pos_seg = []
        for target in targets:
            gt_names = target["gt_names"]
            all_ids = list(np.asarray(target["input_ids"]).tolist())
            for name in gt_names:
                ids = self.tokenizer(name + ". ").input_ids[1:-1]
                start_i, end_i = search_query_pos(all_ids, ids)
                assert start_i != end_i, f"cannot find query {name}"
                pos_seg.append((start_i, end_i))
        M = len(pos_seg)
        Mp = MP

        # segment-mean membership matrix [T, Mp]
        seg_w = np.zeros((T, Mp), dtype=np.float32)
        for j, (s, e) in enumerate(pos_seg):
            seg_w[s:e, j] = 1.0 / float(e - s)

        logits_flat = outputs["pred_logits"].reshape(bs * num_queries, T).astype(jnp.float32)
        out_bbox = outputs["pred_boxes"].reshape(bs * num_queries, 4).astype(jnp.float32)
        tgt_bbox = jnp.concatenate([t["boxes"] for t in targets], axis=0).astype(jnp.float32)
        # pad with dummy valid boxes so padded lanes stay well-behaved
        pad_box = jnp.tile(jnp.array([[0.5, 0.5, 0.5, 0.5]], jnp.float32), (Mp - M, 1))
        tgt_bbox_p = jnp.concatenate([tgt_bbox, pad_box], axis=0)      # [Mp, 4]

        # precompute xyxy conversion + areas outside the pairwise kernel
        obox_feat = box_features_cxcywh(out_bbox)                      # [N, 9]
        tbox_feat = box_features_cxcywh(tgt_bbox_p).T                  # [9, Mp]

        C_pad = matcher_cost_matrix(
            logits_flat, jnp.asarray(seg_w), obox_feat, tbox_feat,
            cost_class=self.cost_class, cost_bbox=self.cost_bbox,
            cost_giou=self.cost_giou, focal_alpha=self.focal_alpha, eps=eps)
        C_pad = jax.block_until_ready(C_pad)
        C = np.asarray(C_pad)[:, :M].reshape(bs, num_queries, M)

        sizes = [int(t["boxes"].shape[0]) for t in targets]
        indices, off = [], 0
        for b in range(bs):
            c_b = C[b][:, off:off + sizes[b]]
            i, j = self._linear_sum_assignment(c_b)
            indices.append((jnp.asarray(i, dtype=jnp.int32),
                            jnp.asarray(j, dtype=jnp.int32)))
            off += sizes[b]
        return indices, C_pad


# ----------------------------------------------------------------------------
# reference (pure numpy) for validation of the kernel math
# ----------------------------------------------------------------------------
def _reference_cost(logits_flat, seg_w, out_bbox, tgt_bbox_t, wc, wb, wg, alpha, eps):
    p = 1.0 / (1.0 + np.exp(-np.asarray(logits_flat, np.float64)))
    neg = (1 - alpha) * p**2 * (-np.log(1 - p + eps))
    pos = alpha * (1 - p)**2 * (-np.log(p + eps))
    cost_class = (pos - neg) @ np.asarray(seg_w, np.float64)
    ob = np.asarray(out_bbox, np.float64)            # [N,4]
    tb = np.asarray(tgt_bbox_t, np.float64).T        # [Mp,4]
    cost_bbox = np.abs(ob[:, None, :] - tb[None, :, :]).sum(-1)
    o_xy = np.concatenate([ob[:, :2] - ob[:, 2:] / 2, ob[:, :2] + ob[:, 2:] / 2], -1)
    t_xy = np.concatenate([tb[:, :2] - tb[:, 2:] / 2, tb[:, :2] + tb[:, 2:] / 2], -1)
    ao = (o_xy[:, 2] - o_xy[:, 0]) * (o_xy[:, 3] - o_xy[:, 1])
    at = (t_xy[:, 2] - t_xy[:, 0]) * (t_xy[:, 3] - t_xy[:, 1])
    lt = np.maximum(o_xy[:, None, :2], t_xy[None, :, :2])
    rb = np.minimum(o_xy[:, None, 2:], t_xy[None, :, 2:])
    wh = np.clip(rb - lt, 0, None)
    inter = wh[..., 0] * wh[..., 1]
    union = ao[:, None] + at[None, :] - inter
    iou = inter / union
    elt = np.minimum(o_xy[:, None, :2], t_xy[None, :, :2])
    erb = np.maximum(o_xy[:, None, 2:], t_xy[None, :, 2:])
    ewh = np.clip(erb - elt, 0, None)
    earea = ewh[..., 0] * ewh[..., 1]
    giou = iou - (earea - union) / earea
    return wb * cost_bbox + wc * cost_class + wg * (-giou)


# ----------------------------------------------------------------------------
if __name__ == "__main__":
    key = jax.random.PRNGKey(0)
    bs, num_queries, T = 2, 8, 32
    tok = ToyTokenizer()

    # synthetic text: "cat. dog." / "bird." split across two images
    def build_input_ids(names):
        ids = [101]
        for n in names:
            ids += tok(n + ". ").input_ids[1:-1]
        ids += [102]
        return np.array(ids + [0] * (T - len(ids)), dtype=np.int64)

    k1, k2, k3, k4 = jax.random.split(key, 4)
    pred_logits = jax.random.normal(k1, (bs, num_queries, T), jnp.float32)
    pred_boxes = jnp.concatenate([
        jax.random.uniform(k2, (bs, num_queries, 2), minval=0.2, maxval=0.8),
        jax.random.uniform(k3, (bs, num_queries, 2), minval=0.1, maxval=0.3)],
        axis=-1).astype(jnp.float32)

    def rand_boxes(k, n):
        ka, kb = jax.random.split(k)
        return jnp.concatenate([
            jax.random.uniform(ka, (n, 2), minval=0.2, maxval=0.8),
            jax.random.uniform(kb, (n, 2), minval=0.1, maxval=0.3)],
            axis=-1).astype(jnp.float32)

    kt0, kt1 = jax.random.split(k4)
    targets = [
        {"gt_names": ["cat", "dog"], "input_ids": build_input_ids(["cat", "dog"]),
         "labels": jnp.array([0, 1]), "boxes": rand_boxes(kt0, 2)},
        {"gt_names": ["bird"], "input_ids": build_input_ids(["bird"]),
         "labels": jnp.array([2]), "boxes": rand_boxes(kt1, 1)},
    ]
    outputs = {"pred_logits": pred_logits, "pred_boxes": pred_boxes}

    matcher = HungarianMatcher(cost_class=1.0, cost_bbox=1.0, cost_giou=1.0,
                               focal_alpha=0.25, tokenizer=tok,
                               has_bbox_supervision=True)
    indices, C_pad = matcher.forward(outputs, targets)
    jax.block_until_ready(C_pad)

    # validate kernel output against a pure-numpy reference
    M = sum(int(t["boxes"].shape[0]) for t in targets)
    seg_w = np.zeros((T, MP), np.float32)
    pos_seg = []
    for t in targets:
        all_ids = list(np.asarray(t["input_ids"]).tolist())
        for n in t["gt_names"]:
            ids = tok(n + ". ").input_ids[1:-1]
            pos_seg.append(search_query_pos(all_ids, ids))
    for j, (s, e) in enumerate(pos_seg):
        seg_w[s:e, j] = 1.0 / (e - s)
    tgt_bbox = np.concatenate([np.asarray(t["boxes"]) for t in targets], 0)
    tgt_pad = np.concatenate([tgt_bbox, np.full((MP - M, 4), 0.5, np.float32)], 0).T
    ref = _reference_cost(np.asarray(pred_logits).reshape(-1, T), seg_w,
                          np.asarray(pred_boxes).reshape(-1, 4), tgt_pad,
                          1.0, 1.0, 1.0, 0.25, 1e-5)
    np.testing.assert_allclose(np.asarray(C_pad)[:, :M], ref[:, :M],
                               rtol=1e-4, atol=1e-4)

    for i, j in indices:
        assert i.shape == j.shape
    print("KERNEL_OK")
</pallas_src>

<mosaic_0001>
module attributes {stable_mosaic.version = 11 : i64} {
  func.func @_matcher_cost_kernel(%arg0: i32, %arg1: memref<16x32xf32, #tpu.memory_space<vmem>>, %arg2: memref<32x128xf32, #tpu.memory_space<vmem>>, %arg3: memref<16x9xf32, #tpu.memory_space<vmem>>, %arg4: memref<9x128xf32, #tpu.memory_space<vmem>>, %arg5: memref<16x128xf32, #tpu.memory_space<vmem>>) attributes {dimension_semantics = [#tpu.dimension_semantics<parallel>], iteration_bounds = array<i64: 1>, scalar_prefetch = 0 : i64, scratch_operands = 0 : i64, tpu.core_type = #tpu.core_type<tc>, window_params = [{transform_indices = @transform_0, window_bounds = array<i64: 16, 32>}, {pipeline_mode = #tpu.pipeline_mode<synchronous>, transform_indices = @transform_1, window_bounds = array<i64: 32, 128>}, {transform_indices = @transform_2, window_bounds = array<i64: 16, 9>}, {pipeline_mode = #tpu.pipeline_mode<synchronous>, transform_indices = @transform_3, window_bounds = array<i64: 9, 128>}, {transform_indices = @transform_4, window_bounds = array<i64: 16, 128>}]} {
    %c0 = arith.constant 0 : index
    %c0_0 = arith.constant 0 : index
    %0 = vector.load %arg1[%c0, %c0_0] : memref<16x32xf32, #tpu.memory_space<vmem>>, vector<16x32xf32>
    %1 = arith.negf %0 : vector<16x32xf32>
    %2 = math.exp %1 : vector<16x32xf32>
    %cst = arith.constant 1.000000e+00 : f32
    %3 = vector.broadcast %cst : f32 to vector<16x32xf32>
    %4 = arith.addf %3, %2 : vector<16x32xf32>
    %5 = arith.divf %3, %4 : vector<16x32xf32>
    %cst_1 = arith.constant 1.000000e+00 : f32
    %6 = vector.broadcast %cst_1 : f32 to vector<16x32xf32>
    %7 = arith.subf %6, %5 : vector<16x32xf32>
    %8 = arith.mulf %5, %5 : vector<16x32xf32>
    %cst_2 = arith.constant 7.500000e-01 : f32
    %9 = vector.broadcast %cst_2 : f32 to vector<16x32xf32>
    %10 = arith.mulf %9, %8 : vector<16x32xf32>
    %cst_3 = arith.constant 9.99999974E-6 : f32
    %11 = vector.broadcast %cst_3 : f32 to vector<16x32xf32>
    %12 = arith.addf %7, %11 : vector<16x32xf32>
    %13 = math.log %12 : vector<16x32xf32>
    %cst_4 = arith.constant 0.000000e+00 : f32
    %14 = vector.broadcast %cst_4 : f32 to vector<16x32xf32>
    %15 = arith.subf %14, %13 : vector<16x32xf32>
    %16 = arith.mulf %10, %15 : vector<16x32xf32>
    %17 = arith.mulf %7, %7 : vector<16x32xf32>
    %cst_5 = arith.constant 2.500000e-01 : f32
    %18 = vector.broadcast %cst_5 : f32 to vector<16x32xf32>
    %19 = arith.mulf %18, %17 : vector<16x32xf32>
    %cst_6 = arith.constant 9.99999974E-6 : f32
    %20 = vector.broadcast %cst_6 : f32 to vector<16x32xf32>
    %21 = arith.addf %5, %20 : vector<16x32xf32>
    %22 = math.log %21 : vector<16x32xf32>
    %cst_7 = arith.constant 0.000000e+00 : f32
    %23 = vector.broadcast %cst_7 : f32 to vector<16x32xf32>
    %24 = arith.subf %23, %22 : vector<16x32xf32>
    %25 = arith.mulf %19, %24 : vector<16x32xf32>
    %26 = arith.subf %25, %16 : vector<16x32xf32>
    %c0_8 = arith.constant 0 : index
    %c0_9 = arith.constant 0 : index
    %27 = vector.load %arg2[%c0_8, %c0_9] : memref<32x128xf32, #tpu.memory_space<vmem>>, vector<32x128xf32>
    %cst_10 = arith.constant dense<0.000000e+00> : vector<16x128xf32>
    %28 = tpu.matmul %26, %27, %cst_10 {dimension_numbers = #tpu.dot_dimension_numbers<[1], [0], [0], [1], [0, 0, 1, 1], [], []>} : vector<16x32xf32>, vector<32x128xf32>, vector<16x128xf32> -> vector<16x128xf32>
    %c0_11 = arith.constant 0 : index
    %c0_12 = arith.constant 0 : index
    %29 = vector.load %arg3[%c0_11, %c0_12] : memref<16x9xf32, #tpu.memory_space<vmem>>, vector<16x9xf32>
    %c0_13 = arith.constant 0 : index
    %c0_14 = arith.constant 0 : index
    %30 = vector.load %arg4[%c0_13, %c0_14] : memref<9x128xf32, #tpu.memory_space<vmem>>, vector<9x128xf32>
    %31 = vector.extract_strided_slice %29 {offsets = [0, 0], sizes = [16, 1], strides = [1, 1]} : vector<16x9xf32> to vector<16x1xf32>
    %32 = vector.shape_cast %31 : vector<16x1xf32> to vector<16x1xf32>
    %33 = vector.broadcast %32 : vector<16x1xf32> to vector<16x128xf32>
    %34 = vector.extract_strided_slice %29 {offsets = [0, 1], sizes = [16, 1], strides = [1, 1]} : vector<16x9xf32> to vector<16x1xf32>
    %35 = vector.shape_cast %34 : vector<16x1xf32> to vector<16x1xf32>
    %36 = vector.broadcast %35 : vector<16x1xf32> to vector<16x128xf32>
    %37 = vector.extract_strided_slice %29 {offsets = [0, 2], sizes = [16, 1], strides = [1, 1]} : vector<16x9xf32> to vector<16x1xf32>
    %38 = vector.shape_cast %37 : vector<16x1xf32> to vector<16x1xf32>
    %39 = vector.broadcast %38 : vector<16x1xf32> to vector<16x128xf32>
    %40 = vector.extract_strided_slice %29 {offsets = [0, 3], sizes = [16, 1], strides = [1, 1]} : vector<16x9xf32> to vector<16x1xf32>
    %41 = vector.shape_cast %40 : vector<16x1xf32> to vector<16x1xf32>
    %42 = vector.broadcast %41 : vector<16x1xf32> to vector<16x128xf32>
    %43 = vector.extract_strided_slice %29 {offsets = [0, 4], sizes = [16, 1], strides = [1, 1]} : vector<16x9xf32> to vector<16x1xf32>
    %44 = vector.shape_cast %43 : vector<16x1xf32> to vector<16x1xf32>
    %45 = vector.broadcast %44 : vector<16x1xf32> to vector<16x128xf32>
    %46 = vector.extract_strided_slice %29 {offsets = [0, 5], sizes = [16, 1], strides = [1, 1]} : vector<16x9xf32> to vector<16x1xf32>
    %47 = vector.shape_cast %46 : vector<16x1xf32> to vector<16x1xf32>
    %48 = vector.broadcast %47 : vector<16x1xf32> to vector<16x128xf32>
    %49 = vector.extract_strided_slice %29 {offsets = [0, 6], sizes = [16, 1], strides = [1, 1]} : vector<16x9xf32> to vector<16x1xf32>
    %50 = vector.shape_cast %49 : vector<16x1xf32> to vector<16x1xf32>
    %51 = vector.broadcast %50 : vector<16x1xf32> to vector<16x128xf32>
    %52 = vector.extract_strided_slice %29 {offsets = [0, 7], sizes = [16, 1], strides = [1, 1]} : vector<16x9xf32> to vector<16x1xf32>
    %53 = vector.shape_cast %52 : vector<16x1xf32> to vector<16x1xf32>
    %54 = vector.broadcast %53 : vector<16x1xf32> to vector<16x128xf32>
    %55 = vector.extract_strided_slice %29 {offsets = [0, 8], sizes = [16, 1], strides = [1, 1]} : vector<16x9xf32> to vector<16x1xf32>
    %56 = vector.shape_cast %55 : vector<16x1xf32> to vector<16x1xf32>
    %57 = vector.broadcast %56 : vector<16x1xf32> to vector<16x128xf32>
    %58 = vector.extract_strided_slice %30 {offsets = [0, 0], sizes = [1, 128], strides = [1, 1]} : vector<9x128xf32> to vector<1x128xf32>
    %59 = vector.extract_strided_slice %30 {offsets = [1, 0], sizes = [1, 128], strides = [1, 1]} : vector<9x128xf32> to vector<1x128xf32>
    %60 = vector.extract_strided_slice %30 {offsets = [2, 0], sizes = [1, 128], strides = [1, 1]} : vector<9x128xf32> to vector<1x128xf32>
    %61 = vector.extract_strided_slice %30 {offsets = [3, 0], sizes = [1, 128], strides = [1, 1]} : vector<9x128xf32> to vector<1x128xf32>
    %62 = vector.extract_strided_slice %30 {offsets = [4, 0], sizes = [1, 128], strides = [1, 1]} : vector<9x128xf32> to vector<1x128xf32>
    %63 = vector.extract_strided_slice %30 {offsets = [5, 0], sizes = [1, 128], strides = [1, 1]} : vector<9x128xf32> to vector<1x128xf32>
    %64 = vector.extract_strided_slice %30 {offsets = [6, 0], sizes = [1, 128], strides = [1, 1]} : vector<9x128xf32> to vector<1x128xf32>
    %65 = vector.extract_strided_slice %30 {offsets = [7, 0], sizes = [1, 128], strides = [1, 1]} : vector<9x128xf32> to vector<1x128xf32>
    %66 = vector.extract_strided_slice %30 {offsets = [8, 0], sizes = [1, 128], strides = [1, 1]} : vector<9x128xf32> to vector<1x128xf32>
    %67 = vector.broadcast %58 : vector<1x128xf32> to vector<16x128xf32>
    %68 = arith.subf %33, %67 : vector<16x128xf32>
    %69 = math.absf %68 : vector<16x128xf32>
    %70 = vector.broadcast %59 : vector<1x128xf32> to vector<16x128xf32>
    %71 = arith.subf %36, %70 : vector<16x128xf32>
    %72 = math.absf %71 : vector<16x128xf32>
    %73 = arith.addf %69, %72 : vector<16x128xf32>
    %74 = vector.broadcast %60 : vector<1x128xf32> to vector<16x128xf32>
    %75 = arith.subf %39, %74 : vector<16x128xf32>
    %76 = math.absf %75 : vector<16x128xf32>
    %77 = arith.addf %73, %76 : vector<16x128xf32>
    %78 = vector.broadcast %61 : vector<1x128xf32> to vector<16x128xf32>
    %79 = arith.subf %42, %78 : vector<16x128xf32>
    %80 = math.absf %79 : vector<16x128xf32>
    %81 = arith.addf %77, %80 : vector<16x128xf32>
    %82 = vector.broadcast %62 : vector<1x128xf32> to vector<16x128xf32>
    %83 = arith.maximumf %45, %82 : vector<16x128xf32>
    %84 = vector.broadcast %63 : vector<1x128xf32> to vector<16x128xf32>
    %85 = arith.maximumf %48, %84 : vector<16x128xf32>
    %86 = vector.broadcast %64 : vector<1x128xf32> to vector<16x128xf32>
    %87 = arith.minimumf %51, %86 : vector<16x128xf32>
    %88 = vector.broadcast %65 : vector<1x128xf32> to vector<16x128xf32>
    %89 = arith.minimumf %54, %88 : vector<16x128xf32>
    %90 = arith.subf %87, %83 : vector<16x128xf32>
    %cst_15 = arith.constant 0.000000e+00 : f32
    %91 = vector.broadcast %cst_15 : f32 to vector<16x128xf32>
    %92 = arith.maximumf %90, %91 : vector<16x128xf32>
    %93 = arith.subf %89, %85 : vector<16x128xf32>
    %cst_16 = arith.constant 0.000000e+00 : f32
    %94 = vector.broadcast %cst_16 : f32 to vector<16x128xf32>
    %95 = arith.maximumf %93, %94 : vector<16x128xf32>
    %96 = arith.mulf %92, %95 : vector<16x128xf32>
    %97 = vector.broadcast %66 : vector<1x128xf32> to vector<16x128xf32>
    %98 = arith.addf %57, %97 : vector<16x128xf32>
    %99 = arith.subf %98, %96 : vector<16x128xf32>
    %cst_17 = arith.constant 9.99999996E-13 : f32
    %100 = vector.broadcast %cst_17 : f32 to vector<16x128xf32>
    %101 = arith.maximumf %99, %100 : vector<16x128xf32>
    %102 = arith.divf %96, %101 : vector<16x128xf32>
    %103 = vector.broadcast %62 : vector<1x128xf32> to vector<16x128xf32>
    %104 = arith.minimumf %45, %103 : vector<16x128xf32>
    %105 = vector.broadcast %63 : vector<1x128xf32> to vector<16x128xf32>
    %106 = arith.minimumf %48, %105 : vector<16x128xf32>
    %107 = vector.broadcast %64 : vector<1x128xf32> to vector<16x128xf32>
    %108 = arith.maximumf %51, %107 : vector<16x128xf32>
    %109 = vector.broadcast %65 : vector<1x128xf32> to vector<16x128xf32>
    %110 = arith.maximumf %54, %109 : vector<16x128xf32>
    %111 = arith.subf %108, %104 : vector<16x128xf32>
    %cst_18 = arith.constant 0.000000e+00 : f32
    %112 = vector.broadcast %cst_18 : f32 to vector<16x128xf32>
    %113 = arith.maximumf %111, %112 : vector<16x128xf32>
    %114 = arith.subf %110, %106 : vector<16x128xf32>
    %cst_19 = arith.constant 0.000000e+00 : f32
    %115 = vector.broadcast %cst_19 : f32 to vector<16x128xf32>
    %116 = arith.maximumf %114, %115 : vector<16x128xf32>
    %117 = arith.mulf %113, %116 : vector<16x128xf32>
    %118 = arith.subf %117, %99 : vector<16x128xf32>
    %cst_20 = arith.constant 9.99999996E-13 : f32
    %119 = vector.broadcast %cst_20 : f32 to vector<16x128xf32>
    %120 = arith.maximumf %117, %119 : vector<16x128xf32>
    %121 = arith.divf %118, %120 : vector<16x128xf32>
    %122 = arith.subf %102, %121 : vector<16x128xf32>
    %cst_21 = arith.constant 0.000000e+00 : f32
    %123 = vector.broadcast %cst_21 : f32 to vector<16x128xf32>
    %124 = arith.subf %123, %122 : vector<16x128xf32>
    %cst_22 = arith.constant 1.000000e+00 : f32
    %125 = vector.broadcast %cst_22 : f32 to vector<16x128xf32>
    %126 = arith.mulf %125, %81 : vector<16x128xf32>
    %cst_23 = arith.constant 1.000000e+00 : f32
    %127 = vector.broadcast %cst_23 : f32 to vector<16x128xf32>
    %128 = arith.mulf %127, %28 : vector<16x128xf32>
    %129 = arith.addf %126, %128 : vector<16x128xf32>
    %cst_24 = arith.constant 1.000000e+00 : f32
    %130 = vector.broadcast %cst_24 : f32 to vector<16x128xf32>
    %131 = arith.mulf %130, %124 : vector<16x128xf32>
    %132 = arith.addf %129, %131 : vector<16x128xf32>
    %c0_25 = arith.constant 0 : index
    %c0_26 = arith.constant 0 : index
    %133 = vector.load %arg5[%c0_25, %c0_26] : memref<16x128xf32, #tpu.memory_space<vmem>>, vector<16x128xf32>
    tpu.vector_store %arg5[%c0_25, %c0_26], %132 {strides = array<i32>} : memref<16x128xf32, #tpu.memory_space<vmem>>, vector<16x128xf32>,
    return
  }
  func.func @transform_0(%arg0: i32) -> (i32, i32) {
    %c0_i32 = arith.constant 0 : i32
    %c0_i32_0 = arith.constant 0 : i32
    return %arg0, %c0_i32 : i32, i32
  }
  func.func @transform_1(%arg0: i32) -> (i32, i32) {
    %c0_i32 = arith.constant 0 : i32
    %c0_i32_0 = arith.constant 0 : i32
    %c0_i32_1 = arith.constant 0 : i32
    return %c0_i32, %c0_i32_0 : i32, i32
  }
  func.func @transform_2(%arg0: i32) -> (i32, i32) {
    %c0_i32 = arith.constant 0 : i32
    %c0_i32_0 = arith.constant 0 : i32
    return %arg0, %c0_i32 : i32, i32
  }
  func.func @transform_3(%arg0: i32) -> (i32, i32) {
    %c0_i32 = arith.constant 0 : i32
    %c0_i32_0 = arith.constant 0 : i32
    %c0_i32_1 = arith.constant 0 : i32
    return %c0_i32, %c0_i32_0 : i32, i32
  }
  func.func @transform_4(%arg0: i32) -> (i32, i32) {
    %c0_i32 = arith.constant 0 : i32
    %c0_i32_0 = arith.constant 0 : i32
    return %arg0, %c0_i32 : i32, i32
  }
}

</mosaic_0001>

<bundles_post_ra>
// kernel: tpu_custom_call.1
= control target key start
LH: loop header
LB: loop body
LE: loop exit
PB: predicated region body
PF: predicated region fallthrough
CT: control target
= control target key end

     0   :  { %9 = vsyncpa [#allocation3], 0  ;;  %s799_s0 = inlined_call_operand.hbm [shape: f32[16,32], index: 0, kind: input, shape index: {}]   ;;  %s800_s1 = inlined_call_operand.hbm [shape: f32[32,128], index: 1, kind: input, shape index: {}]   ;;  %s801_s2 = inlined_call_operand.hbm [shape: f32[16,9], index: 2, kind: input, shape index: {}]   ;;  %s802_s3 = inlined_call_operand.hbm [shape: f32[9,128], index: 3, kind: input, shape index: {}]   ;;  %s803_s4 = inlined_call_operand.hbm [shape: f32[16,128], index: 4, kind: output, shape index: {}]  }
   0x1   :  { %10 = vsyncpa [#allocation6], 0 }
   0x2   :  { %11 = vsyncpa [#allocation9], 0 }
   0x3   :  { %12 = vsyncpa [#allocation4], 0  ;;  %s627_s15 = smov [#allocation5]   ;;  %s628_s17 = smov [#allocation2]  }
   0x4   :  { %s30_s16 = sshll.u32 %s627_s15, 4  ;;  %s18_s18 = sshll.u32 %s628_s17, 4  ;;  %s31_s16 = int_to_ptr.vmem [resolvable:$true] %s30_s16  ;;  %s668_s18 = int_to_ptr.vmem [resolvable:$true] %s18_s18 }
   0x5   :  { %s509_s21 = scalar_lea.hbm %s800_s1, 512 }
   0x6   :  { %p510_p0 = scmp.ne.s32.totalorder %s800_s1, %s509_s21  ;;  %p513_p1 = scmp.lt.u32.totalorder %s509_s21, %s800_s1 }
   0x8   :  { %p515_p2 = pnand %p513_p1, %p510_p0 }
   0xa   :  { %518 = shalt.err (!%p515_p2)
}
   0xb   :  { %s519_s26 = scalar_lea.vmem %s31_s16, 512  ;;  %p524_p4 = scmp.lt.s32.totalorder %s31_s16, %s31_s16 }
   0xc   :  { %p520_p3 = scmp.ne.s32.totalorder %s31_s16, %s519_s26  ;;  %p525_p5 = scmp.lt.s32.totalorder %s519_s26, %s519_s26 }
   0xe   :  { %p526_p6 = por %p525_p5, %p524_p4 }
  0x10   :  { %p527_p7 = pnand %p526_p6, %p520_p3 }
  0x12   :  { %530 = shalt.err (!%p527_p7)
}
  0x13   :  { %s629_s27 = smov 128   ;;  %s630_s28 = smov 8  }
  0x14   :  { %36 = dma.hbm_to_vmem [thread:$0]  %s800_s1, 512, %s31_s16, [#allocation6], %s629_s27, %s629_s27, %s630_s28  }
  0x15   :  { %s531_s7 = scalar_lea.hbm %s799_s0, 256 }
  0x16   :  { %p532_p8 = scmp.ne.s32.totalorder %s799_s0, %s531_s7  ;;  %p535_p9 = scmp.lt.u32.totalorder %s531_s7, %s799_s0 }
  0x18   :  { %p537_p10 = pnand %p535_p9, %p532_p8 }
  0x1a   :  { %540 = shalt.err (!%p537_p10)
}
  0x1b   :  { %s541_s12 = scalar_lea.vmem %s668_s18, 256  ;;  %p546_p12 = scmp.lt.s32.totalorder %s668_s18, %s668_s18 }
  0x1c   :  { %p542_p11 = scmp.ne.s32.totalorder %s668_s18, %s541_s12  ;;  %p547_p13 = scmp.lt.s32.totalorder %s541_s12, %s541_s12 }
  0x1e   :  { %p548_p0 = por %p547_p13, %p546_p12 }
  0x20   :  { %p549_p1 = pnand %p548_p0, %p542_p11 }
  0x22   :  { %552 = shalt.err (!%p549_p1)
}
  0x23   :  { %24 = dma.hbm_to_vmem [thread:$0]  %s799_s0, 256, %s668_s18, [#allocation3], %s629_s27, %s629_s27, %s630_s28  }
  0x24   :  { %s631_s14 = smov [#allocation7]   ;;  %s632_s16 = smov [#allocation8]  }
  0x25   :  { %s42_s15 = sshll.u32 %s631_s14, 4  ;;  %s54_s17 = sshll.u32 %s632_s16, 4  ;;  %s43_s15 = int_to_ptr.vmem [resolvable:$true] %s42_s15  ;;  %s705_s17 = int_to_ptr.vmem [resolvable:$true] %s54_s17 }
  0x26   :  { %s553_s21 = scalar_lea.hbm %s801_s2, 256 }
  0x27   :  { %p554_p2 = scmp.ne.s32.totalorder %s801_s2, %s553_s21  ;;  %p557_p3 = scmp.lt.u32.totalorder %s553_s21, %s801_s2 }
  0x29   :  { %p559_p4 = pnand %p557_p3, %p554_p2 }
  0x2b   :  { %562 = shalt.err (!%p559_p4)
}
  0x2c   :  { %s563_s0 = scalar_lea.vmem %s43_s15, 256  ;;  %p568_p6 = scmp.lt.s32.totalorder %s43_s15, %s43_s15 }
  0x2d   :  { %p564_p5 = scmp.ne.s32.totalorder %s43_s15, %s563_s0  ;;  %p569_p7 = scmp.lt.s32.totalorder %s563_s0, %s563_s0 }
  0x2f   :  { %p570_p8 = por %p569_p7, %p568_p6 }
  0x31   :  { %p571_p9 = pnand %p570_p8, %p564_p5 }
  0x33   :  { %574 = shalt.err (!%p571_p9)
}
  0x34   :  { %48 = dma.hbm_to_vmem [thread:$0]  %s801_s2, 256, %s43_s15, [#allocation6], %s629_s27, %s629_s27, %s630_s28  }
  0x35   :  { %s575_s5 = scalar_lea.hbm %s802_s3, 256 }
  0x36   :  { %p576_p10 = scmp.ne.s32.totalorder %s802_s3, %s575_s5  ;;  %p579_p11 = scmp.lt.u32.totalorder %s575_s5, %s802_s3 }
  0x38   :  { %p581_p12 = pnand %p579_p11, %p576_p10 }
  0x3a   :  { %584 = shalt.err (!%p581_p12)
}
  0x3b   :  { %s585_s10 = scalar_lea.vmem %s705_s17, 256  ;;  %p590_p0 = scmp.lt.s32.totalorder %s705_s17, %s705_s17 }
  0x3c   :  { %p586_p13 = scmp.ne.s32.totalorder %s705_s17, %s585_s10  ;;  %p591_p1 = scmp.lt.s32.totalorder %s585_s10, %s585_s10 }
  0x3e   :  { %p592_p2 = por %p591_p1, %p590_p0 }
  0x40   :  { %p593_p3 = pnand %p592_p2, %p586_p13 }
  0x42   :  { %596 = shalt.err (!%p593_p3)
}
  0x43   :  { %60 = dma.hbm_to_vmem [thread:$0]  %s802_s3, 256, %s705_s17, [#allocation9], %s629_s27, %s629_s27, %s630_s28  }
  0x44   :  { %619 = dma.done.wait [#allocation3], 256  }
  0x45   :  { %620 = vsyncadd [#allocation3], 4294967040 }
  0x46   :  { %621 = dma.done.wait [#allocation6], 768  }
  0x47   :  { %622 = vsyncadd [#allocation6], 4294966528 }
  0x48   :  { %623 = dma.done.wait [#allocation9], 256  }
  0x49   :  { %624 = vsyncadd [#allocation9], 4294967040  ;;  %v633_v0 = vmov 5   ;;  %v634_v1 = vmov 4   ;;  %v119_v2 = vld [vmem:[#allocation5] sm:$0xff]  ;;  %v120_v3 = vld [vmem:[#allocation5 + $0x8] sm:$0xff]  ;;  %v283_v62 = vlaneseq }
  0x4a   :  { %471 = vset.pattern.permute.xlu1 %v633_v0  ;;  %470 = vset.pattern.permute.xlu0 %v634_v1  ;;  %v121_v4 = vld [vmem:[#allocation5 + $0x10] sm:$0xff]  ;;  %v446_v5 = vpack.c.bf16 %v120_v3, %v119_v2  ;;  %v122_v6 = vld [vmem:[#allocation5 + $0x18] sm:$0xff]  ;;  %v742_v8 = vld [vmem:[#allocation7] sm:$0xff]  ;;  %v635_v14 = vmov 6   ;;  %v636_v18 = vmov 7   ;;  %v637_v20 = vmov 8  }
  0x4b   :  { %v73_v7 = vld [vmem:[#allocation2] sm:$0xff]  ;;  %v450_v9 = vpack.c.bf16 %v122_v6, %v121_v4  ;;  %252 = vperm.xlu1 %471, %v742_v8   ;;  %v74_v11 = vld [vmem:[#allocation2 + $0x8] sm:$0xff]  ;;  %244 = vperm.xlu0 %470, %v742_v8   ;;  %v746_v13 = vld [vmem:[#allocation7 + $0x8] sm:$0xff]  ;;  %v638_v21 = vmov 0   ;;  %v639_v22 = vmov 1   ;;  %v640_v30 = vmov 3  }
  0x4c   :  { %v424_v10 = vmul.f32 -1.442695, %v73_v7  ;;  %447 = vmatprep.subr.bf16.mxu0 %v446_v5  ;;  %v425_v12 = vmul.f32 -1.442695, %v74_v11  ;;  %v641_v35 = vmov 2   ;;  %vm123_vm0 = vcmask 261120  }
  0x4d   :  { %449 = vmatpush3.bf16.msra.mxu0 %v446_v5  ;;  %v764_v1 = vshrl.u32 %v283_v62, 7  ;;  %s642_s3 = smov [#allocation10]  }
  0x4e   :  { %485 = vpow2.f32 %v424_v10  ;;  %451 = vmatprep.subr.bf16.mxu0 %v450_v9  ;;  %s410_s12 = sshll.u32 %s642_s3, 4  ;;  %s411_s12 = int_to_ptr.vmem [resolvable:$true] %s410_s12 }
  0x4f   :  { %487 = vpow2.f32 %v425_v12  ;;  %256 = vperm.xlu1 %471, %v746_v13   ;;  %248 = vperm.xlu0 %470, %v746_v13   ;;  %v329_v3 = vsub.s32 5, %v764_v1  ;;  %v323_v4 = vsub.s32 4, %v764_v1  ;;  %v335_v5 = vsub.s32 6, %v764_v1  ;;  %s597_s1 = scalar_lea.vmem %s411_s12, 256  ;;  %p602_p5 = scmp.lt.s32.totalorder %s411_s12, %s411_s12 }
  0x50   :  { %v341_v6 = vsub.s32 7, %v764_v1  ;;  %v285_v62 = vsub.s32 0, %v764_v1  ;;  %p598_p4 = scmp.ne.s32.totalorder %s411_s12, %s597_s1  ;;  %p603_p6 = scmp.lt.s32.totalorder %s597_s1, %s597_s1 }
  0x51   :  { %453 = vmatpush3.bf16.msra.mxu0 %v450_v9 }
  0x52   :  { %p604_p7 = por %p603_p6, %p602_p5 }
  0x53   :  { %473 = vset.pattern.permute.xlu1 %v635_v14  ;;  %472 = vset.pattern.permute.xlu0 %v635_v14 }
  0x54   :  { %264 = vperm.xlu1 %473, %v746_v13   ;;  %260 = vperm.xlu0 %472, %v742_v8   ;;  %p605_p8 = pnand %p604_p7, %p598_p4 }
  0x58   :  { %v486_v15 = vpop.eup %485  ;;  %474 = vset.pattern.permute.xlu1 %v636_v18  ;;  %475 = vset.pattern.permute.xlu0 %v636_v18 }
  0x59   :  { %v488_v16 = vpop.eup %487  ;;  %v81_v17 = vadd.f32 1.0, %v486_v15  ;;  %268 = vperm.xlu1 %474, %v742_v8   ;;  %272 = vperm.xlu0 %475, %v746_v13  }
  0x5a   :  { %v82_v19 = vadd.f32 1.0, %v488_v16 }
  0x5b   :  { %489 = vrcp.f32 %v81_v17 }
  0x5c   :  { %491 = vrcp.f32 %v82_v19 }
  0x5d   :  { %476 = vset.pattern.permute.xlu1 %v637_v20  ;;  %477 = vset.pattern.permute.xlu0 %v638_v21 }
  0x5e   :  { %276 = vperm.xlu1 %476, %v742_v8   ;;  %211 = vperm.xlu0 %477, %v742_v8  }
  0x62   :  { %280 = vperm.xlu1 %476, %v746_v13   ;;  %480 = vset.pattern.permute.xlu0 %v639_v22 }
  0x63   :  { %224 = vperm.xlu0 %480, %v746_v13  }
  0x65   :  { %v490_v23 = vpop.eup %489 }
  0x66   :  { %v492_v24 = vpop.eup %491  ;;  %v87_v25 = vsub.f32 1.0, %v490_v23  ;;  %v107_v26 = vadd.f32 1e-05, %v490_v23  ;;  %478 = vset.pattern.permute.xlu1 %v638_v21  ;;  %v89_v34 = vmul.f32 %v490_v23, %v490_v23 }
  0x67   :  { %v88_v27 = vsub.f32 1.0, %v492_v24  ;;  %v108_v28 = vadd.f32 1e-05, %v492_v24  ;;  %216 = vperm.xlu1 %478, %v746_v13   ;;  %482 = vset.pattern.permute.xlu0 %v640_v30  ;;  %v90_v37 = vmul.f32 %v492_v24, %v492_v24 }
  0x68   :  { %v93_v29 = vadd.f32 1e-05, %v87_v25  ;;  %493 = vlog2.f32 %v107_v26  ;;  %236 = vperm.xlu0 %482, %v742_v8   ;;  %v103_v32 = vmul.f32 %v87_v25, %v87_v25  ;;  %v91_v45 = vmul.f32 0.75, %v89_v34 }
  0x69   :  { %v94_v31 = vadd.f32 1e-05, %v88_v27  ;;  %495 = vlog2.f32 %v108_v28  ;;  %v104_v33 = vmul.f32 %v88_v27, %v88_v27  ;;  %v92_v48 = vmul.f32 0.75, %v90_v37 }
  0x6a   :  { %497 = vlog2.f32 %v93_v29  ;;  %v105_v39 = vmul.f32 0.25, %v103_v32 }
  0x6b   :  { %499 = vlog2.f32 %v94_v31  ;;  %479 = vset.pattern.permute.xlu1 %v639_v22  ;;  %v106_v42 = vmul.f32 0.25, %v104_v33 }
  0x6c   :  { %220 = vperm.xlu1 %479, %v742_v8   ;;  %484 = vset.pattern.permute.xlu0 %v637_v20 }
  0x70   :  { %481 = vset.pattern.permute.xlu1 %v641_v35 }
  0x71   :  { %228 = vperm.xlu1 %481, %v742_v8   ;;  %v770_v8 = vld [vmem:[#allocation8] sm:$0xff] }
  0x72   :  { %v494_v36 = vpop.eup %493  ;;  %v330_v9 = vrot.slane %v770_v8, %v329_v3  ;;  %v324_v10 = vrot.slane %v770_v8, %v323_v4  ;;  %v336_v11 = vrot.slane %v770_v8, %v335_v5  ;;  %v342_v12 = vrot.slane %v770_v8, %v341_v6 }
  0x73   :  { %v496_v38 = vpop.eup %495  ;;  %v110_v40 = vmul.f32 0.6931472, %v494_v36  ;;  %v286_v4 = vrot.slane %v770_v8, %v285_v62  ;;  %v303_v6 = vsub.s32 2, %v764_v1 }
  0x74   :  { %v498_v41 = vpop.eup %497  ;;  %v112_v43 = vmul.f32 0.6931472, %v496_v38 }
  0x75   :  { %v500_v44 = vpop.eup %499  ;;  %v96_v46 = vmul.f32 0.6931472, %v498_v41  ;;  %v113_v47 = vsub.f32 0.0, %v110_v40  ;;  %232 = vperm.xlu1 %481, %v746_v13  }
  0x76   :  { %v98_v49 = vmul.f32 0.6931472, %v500_v44  ;;  %v114_v50 = vsub.f32 0.0, %v112_v43 }
  0x77   :  { %v99_v51 = vsub.f32 0.0, %v96_v46  ;;  %v115_v52 = vmul.f32 %v113_v47, %v105_v39 }
  0x78   :  { %v100_v53 = vsub.f32 0.0, %v98_v49  ;;  %v116_v54 = vmul.f32 %v114_v50, %v106_v42 }
  0x79   :  { %v101_v55 = vmul.f32 %v99_v51, %v91_v45  ;;  %483 = vset.pattern.permute.xlu1 %v640_v30  ;;  %v428_v45 = vld [vmem:[#allocation8 + $0x8] ss:$0 sm:$0xff] }
  0x7a   :  { %v102_v56 = vmul.f32 %v100_v53, %v92_v48  ;;  %240 = vperm.xlu1 %483, %v746_v13  }
  0x7b   :  { %v117_v57 = vsub.f32 %v115_v52, %v101_v55 }
  0x7c   :  { %v118_v58 = vsub.f32 %v116_v54, %v102_v56 }
  0x7d   :  { %443 = vmatprep.mubr.msk.f32.mxu0 %vm123_vm0, %v117_v57 }
  0x7e   :  { %444 = vmatmul.mubr.msk.f32.vlgmr.msra.gmra.mrb[0].mxu0 %vm123_vm0, %v118_v58 }
  0xca   :  { %v253_v59 = vpop.permute.xlu1 %252  ;;  %v245_v60 = vpop.permute.xlu0 %244 }
  0xcb   :  { %v331_v19 = vmax.f32 %v253_v59, %v330_v9  ;;  %v325_v20 = vmax.f32 %v245_v60, %v324_v10  ;;  %v371_v23 = vmin.f32 %v253_v59, %v330_v9  ;;  %v369_v24 = vmin.f32 %v245_v60, %v324_v10 }
  0xce   :  { %v257_v61 = vpop.permute.xlu1 %256  ;;  %v249_v63 = vpop.permute.xlu0 %248 }
  0xcf   :  { %v332_v15 = vmax.f32 %v257_v61, %v330_v9  ;;  %v326_v16 = vmax.f32 %v249_v63, %v324_v10  ;;  %v372_v27 = vmin.f32 %v257_v61, %v330_v9  ;;  %v370_v28 = vmin.f32 %v249_v63, %v324_v10 }
  0xd0   :  { %v293_v63 = vsub.s32 1, %v764_v1 }
  0xd2   :  { %v294_v5 = vrot.slane %v770_v8, %v293_v63 }
  0xd3   :  { %v265_v0 = vpop.permute.xlu1 %264  ;;  %v261_v2 = vpop.permute.xlu0 %260 }
  0xd4   :  { %v338_v17 = vmin.f32 %v265_v0, %v336_v11  ;;  %v337_v21 = vmin.f32 %v261_v2, %v336_v11  ;;  %v373_v25 = vmax.f32 %v261_v2, %v336_v11  ;;  %v374_v29 = vmax.f32 %v265_v0, %v336_v11 }
  0xd5   :  { %v304_v11 = vrot.slane %v770_v8, %v303_v6 }
  0xd6   :  { %v346_v31 = vsub.f32 %v338_v17, %v326_v16  ;;  %v345_v34 = vsub.f32 %v337_v21, %v325_v20  ;;  %v377_v36 = vsub.f32 %v373_v25, %v369_v24  ;;  %v378_v38 = vsub.f32 %v374_v29, %v370_v28 }
  0xd8   :  { %v269_v7 = vpop.permute.xlu1 %268  ;;  %v273_v13 = vpop.permute.xlu0 %272  ;;  %v348_v40 = vmax.f32 %v346_v31, 0.0  ;;  %v347_v43 = vmax.f32 %v345_v34, 0.0  ;;  %v379_v46 = vmax.f32 %v377_v36, 0.0  ;;  %v380_v48 = vmax.f32 %v378_v38, 0.0 }
  0xd9   :  { %v344_v18 = vmin.f32 %v273_v13, %v342_v12  ;;  %v343_v22 = vmin.f32 %v269_v7, %v342_v12  ;;  %v375_v26 = vmax.f32 %v269_v7, %v342_v12  ;;  %v376_v30 = vmax.f32 %v273_v13, %v342_v12 }
  0xda   :  { %v313_v13 = vsub.s32 3, %v764_v1 }
  0xdb   :  { %v350_v32 = vsub.f32 %v344_v18, %v332_v15  ;;  %v349_v35 = vsub.f32 %v343_v22, %v331_v19  ;;  %v381_v37 = vsub.f32 %v375_v26, %v371_v23  ;;  %v382_v39 = vsub.f32 %v376_v30, %v372_v27 }
  0xdc   :  { %v314_v19 = vrot.slane %v770_v8, %v313_v13 }
  0xdd   :  { %v277_v14 = vpop.permute.xlu1 %276  ;;  %v352_v41 = vmax.f32 %v350_v32, 0.0  ;;  %v351_v44 = vmax.f32 %v349_v35, 0.0  ;;  %v383_v47 = vmax.f32 %v381_v37, 0.0  ;;  %v384_v49 = vmax.f32 %v382_v39, 0.0  ;;  %v212_v60 = vpop.permute.xlu0 %211 }
  0xde   :  { %v359_v53 = vadd.f32 %v428_v45, %v277_v14  ;;  %v287_v15 = vsub.f32 %v212_v60, %v286_v4 }
  0xdf   :  { %v354_v50 = vmul.f32 %v352_v41, %v348_v40  ;;  %v353_v52 = vmul.f32 %v351_v44, %v347_v43  ;;  %v385_v54 = vmul.f32 %v383_v47, %v379_v46  ;;  %v386_v56 = vmul.f32 %v384_v49, %v380_v48 }
  0xe0   :  { %v289_v23 = vand.u32 2147483647, %v287_v15 }
  0xe1   :  { %v281_v33 = vpop.permute.xlu1 %280  ;;  %v361_v58 = vsub.f32 %v359_v53, %v353_v52  ;;  %v389_v59 = vmax.f32 %v385_v54, 1e-12  ;;  %v390_v61 = vmax.f32 %v386_v56, 1e-12 }
  0xe2   :  { %v360_v51 = vadd.f32 %v428_v45, %v281_v33  ;;  %v225_v7 = vpop.permute.xlu0 %224 }
  0xe3   :  { %v363_v3 = vmax.f32 %v361_v58, 1e-12  ;;  %501 = vrcp.f32 %v389_v59  ;;  %v296_v12 = vsub.f32 %v225_v7, %v294_v5  ;;  %v387_v29 = vsub.f32 %v385_v54, %v361_v58 }
  0xe4   :  { %v362_v57 = vsub.f32 %v360_v51, %v354_v50  ;;  %503 = vrcp.f32 %v390_v61 }
  0xe5   :  { %v298_v18 = vand.u32 2147483647, %v296_v12 }
  0xe6   :  { %v217_v42 = vpop.permute.xlu1 %216  ;;  %v364_v0 = vmax.f32 %v362_v57, 1e-12  ;;  %v388_v26 = vsub.f32 %v386_v56, %v362_v57 }
  0xe7   :  { %v288_v10 = vsub.f32 %v217_v42, %v286_v4  ;;  %v237_v27 = vpop.permute.xlu0 %236 }
  0xe8   :  { %505 = vrcp.f32 %v364_v0  ;;  %v315_v35 = vsub.f32 %v237_v27, %v314_v19 }
  0xe9   :  { %507 = vrcp.f32 %v363_v3  ;;  %v290_v16 = vand.u32 2147483647, %v288_v10 }
  0xea   :  { %v317_v41 = vand.u32 2147483647, %v315_v35 }
  0xeb   :  { %v221_v55 = vpop.permute.xlu1 %220  ;;  %v300_v1 = vadd.f32 %v298_v18, %v290_v16 }
  0xec   :  { %v295_v14 = vsub.f32 %v221_v55, %v294_v5 }
  0xed   :  { %v502_v20 = vpop.eup %501 }
  0xee   :  { %v297_v21 = vand.u32 2147483647, %v295_v14  ;;  %v504_v25 = vpop.eup %503  ;;  %v392_v38 = vmul.f32 %v502_v20, %v387_v29 }
  0xef   :  { %v394_v37 = vmul.f32 %v504_v25, %v388_v26 }
  0xf0   :  { %v229_v2 = vpop.permute.xlu1 %228  ;;  %v299_v34 = vadd.f32 %v297_v21, %v289_v23 }
  0xf1   :  { %v305_v22 = vsub.f32 %v229_v2, %v304_v11 }
  0xf2   :  { %v506_v28 = vpop.eup %505 }
  0xf3   :  { %v508_v30 = vpop.eup %507  ;;  %v307_v33 = vand.u32 2147483647, %v305_v22  ;;  %v368_v36 = vmul.f32 %v506_v28, %v354_v50 }
  0xf4   :  { %v233_v9 = vpop.permute.xlu1 %232  ;;  %v366_v8 = vmul.f32 %v508_v30, %v353_v52 }
  0xf5   :  { %v306_v17 = vsub.f32 %v233_v9, %v304_v11  ;;  %v309_v42 = vadd.f32 %v307_v33, %v299_v34  ;;  %v396_v43 = vsub.f32 %v368_v36, %v394_v37 }
  0xf6   :  { %v395_v44 = vsub.f32 %v366_v8, %v392_v38 }
  0xf7   :  { %v308_v31 = vand.u32 2147483647, %v306_v17  ;;  %v319_v47 = vadd.f32 %v317_v41, %v309_v42  ;;  %v398_v48 = vsub.f32 0.0, %v396_v43 }
  0xf8   :  { %v397_v53 = vsub.f32 0.0, %v395_v44 }
  0xf9   :  { %v241_v24 = vpop.permute.xlu1 %240  ;;  %v310_v40 = vadd.f32 %v308_v31, %v300_v1 }
  0xfa   :  { %v316_v32 = vsub.f32 %v241_v24, %v314_v19 }
  0xfc   :  { %v318_v39 = vand.u32 2147483647, %v316_v32 }
  0xfe   :  { %v320_v45 = vadd.f32 %v318_v39, %v310_v40 }
 0x151   :  { %v445_v46 = vpop.f32.mrb[0].mxu0 }
 0x152   :  { %v400_v49 = vadd.f32 %v445_v46, %v320_v45  ;;  %v196_v51 = vpop.f32.mrb[1].mxu0 }
 0x153   :  { %v399_v54 = vadd.f32 %v319_v47, %v196_v51 }
 0x154   :  { %v402_v50 = vadd.f32 %v400_v49, %v398_v48 }
 0x155   :  { %v401_v55 = vadd.f32 %v399_v54, %v397_v53 }
 0x156   :  { %404 = vst [vmem:[#allocation10 + $0x8] sm:$0xff] %v402_v50 }
 0x157   :  { %403 = vst [vmem:[#allocation10] sm:$0xff] %v401_v55 }
 0x158   :  { %608 = shalt.err (!%p605_p8)
}
 0x159   :  { %s609_s15 = scalar_lea.hbm %s803_s4, 256 }
 0x15a   :  { %p610_p9 = scmp.ne.s32.totalorder %s803_s4, %s609_s15  ;;  %p613_p10 = scmp.lt.u32.totalorder %s609_s15, %s803_s4 }
 0x15c   :  { %p615_p11 = pnand %p613_p10, %p610_p9 }
 0x15e   :  { %618 = shalt.err (!%p615_p11)
}
 0x15f   :  { %416 = dma.vmem_to_hbm [thread:$0]  %s411_s12, 256, %s803_s4, [#allocation4], %s629_s27, %s629_s27, %s630_s28  }
 0x160   :  { %625 = dma.done.wait [#allocation4], 256  }
 0x161   :  { %626 = vsyncadd [#allocation4], 4294967040 }
 0x162   :  { %420 = vsyncpa [#allocation3], 1 }
 0x163   :  { %421 = vsyncpa [#allocation6], 1 }
 0x164   :  { %422 = vsyncpa [#allocation9], 1 }
 0x165   :  { %423 = vsyncpa [#allocation4], 1 }

</bundles_post_ra>
